<compile_context>
chip_gen: v6e
topology: v6e:2x2x1
jax: 0.10.0
libtpu: 0.0.40
codegen_flags: <defaults>
</compile_context>

<pallas_src>
import jax
import jax.numpy as jnp
from jax.experimental import pallas as pl
from jax.experimental.pallas import tpu as pltpu

_MIB = 1024 * 1024


def _log_softmax_rows_kernel(x_ref, o_ref):
    # Softmax axis is the last (lane) axis.
    x = x_ref[...].astype(jnp.float32)
    m = jnp.max(x, axis=-1, keepdims=True)
    s = x - m
    lse = jnp.log(jnp.sum(jnp.exp(s), axis=-1, keepdims=True))
    o_ref[...] = (s - lse).astype(o_ref.dtype)


def _log_softmax_cols_kernel(x_ref, o_ref):
    # Softmax axis is the first (sublane) axis; lanes hold independent rows.
    x = x_ref[...].astype(jnp.float32)
    m = jnp.max(x, axis=0, keepdims=True)
    s = x - m
    lse = jnp.log(jnp.sum(jnp.exp(s), axis=0, keepdims=True))
    o_ref[...] = (s - lse).astype(o_ref.dtype)


def _round_up(v, mult):
    return ((v + mult - 1) // mult) * mult


def _vmem_budget_bytes():
    """Scoped VMEM limit to request, derived from physical VMEM with headroom."""
    cap = 64 * _MIB  # conservative default (v7x per-TensorCore VMEM)
    try:
        info = pltpu.get_tpu_info()
        cap = int(getattr(info, "vmem_capacity_bytes", cap))
    except Exception:
        pass
    # ~48 MiB on v7x (64 MiB physical), 96 MiB on v5e/v6e (128 MiB physical).
    return max(32 * _MIB, min(cap * 3 // 4, 96 * _MIB))


def _pick_tile(num_rows, reduce_len, itemsize, vmem_limit, granule):
    """Largest tile along the independent axis whose pipeline footprint fits.

    Footprint per tile row: double-buffered input + output blocks plus ~3 f32
    temporaries (x, exp(s), result) live inside the kernel body.
    """
    bytes_per_row = reduce_len * (4 * itemsize + 3 * 4)
    budget = int(vmem_limit * 0.6)  # headroom under the scoped limit
    tile = (budget // max(bytes_per_row, 1)) // granule * granule
    tile = max(granule, min(tile, 4096))  # beyond a few MiB there is no gain
    # Prefer >= ~4 grid steps (pipeline depth / megacore sharding) as long as
    # each input block stays >= ~1 MiB.
    min_rows_1mib = _round_up(max(1, _MIB // max(reduce_len * itemsize, 1)),
                              granule)
    quarter = _round_up(pl.cdiv(num_rows, 4), granule)
    tile = min(tile, max(min_rows_1mib, quarter))
    # Never exceed the (rounded-up) axis itself.
    return max(granule, min(tile, _round_up(num_rows, granule)))


def log_softmax(x):
    """log_softmax along the last axis, computed in a Pallas TPU kernel."""
    orig_shape = x.shape
    if x.ndim == 0:
        return jnp.zeros_like(x)  # log_softmax of a scalar is 0
    n = orig_shape[-1]
    x2 = x.reshape(-1, n)
    m = x2.shape[0]
    itemsize = x2.dtype.itemsize

    vmem_limit = _vmem_budget_bytes()
    cparams = pltpu.CompilerParams(
        dimension_semantics=("parallel",),
        vmem_limit_bytes=vmem_limit,
    )

    if n >= 128:
        # Lane-axis path: softmax axis is lane-dense.
        tm = _pick_tile(m, n, itemsize, vmem_limit, granule=8)
        out = pl.pallas_call(
            _log_softmax_rows_kernel,
            out_shape=jax.ShapeDtypeStruct((m, n), x.dtype),
            grid=(pl.cdiv(m, tm),),
            in_specs=[pl.BlockSpec((tm, n), lambda i: (i, 0))],
            out_specs=pl.BlockSpec((tm, n), lambda i: (i, 0)),
            compiler_params=cparams,
        )(x2)
        return out.reshape(orig_shape)

    # Small-N path: transpose so the softmax axis is on sublanes and the row
    # axis is lane-dense (tile is a multiple of 128 -> unmasked stores).
    xt = x2.T  # (n, m)
    tc = _pick_tile(m, n, itemsize, vmem_limit, granule=128)
    out_t = pl.pallas_call(
        _log_softmax_cols_kernel,
        out_shape=jax.ShapeDtypeStruct((n, m), x.dtype),
        grid=(pl.cdiv(m, tc),),
        in_specs=[pl.BlockSpec((n, tc), lambda i: (0, i))],
        out_specs=pl.BlockSpec((n, tc), lambda i: (0, i)),
        compiler_params=cparams,
    )(xt)
    return out_t.T.reshape(orig_shape)


if __name__ == "__main__":
    key = jax.random.PRNGKey(0)

    # Primary example consistent with the module (arbitrary-shape log_softmax).
    x = jax.random.normal(key, (2, 4, 16, 16), dtype=jnp.float32)
    y = jax.block_until_ready(log_softmax(x))
    ref = jax.nn.log_softmax(x, axis=-1)
    assert jnp.allclose(y, ref, atol=2e-5, rtol=2e-5), "mismatch (small-N path)"

    # Exercise both layouts, divisible and non-divisible row counts, and a
    # low-precision dtype.
    checks = [
        ((4, 8, 256), jnp.float32),    # lane-axis path, divisible rows
        ((3, 5, 256), jnp.float32),    # lane-axis path, partial row block
        ((3, 7, 16), jnp.float32),     # small-N path, partial lane block
        ((2, 4, 16, 16), jnp.bfloat16),
    ]
    for i, (shape, dt) in enumerate(checks):
        k = jax.random.fold_in(key, i + 1)
        xi = (jax.random.normal(k, shape, dtype=jnp.float32) * 3.0).astype(dt)
        yi = jax.block_until_ready(log_softmax(xi))
        refi = jax.nn.log_softmax(xi.astype(jnp.float32), axis=-1).astype(dt)
        tol = 2e-5 if dt == jnp.float32 else 1e-1
        assert jnp.allclose(yi.astype(jnp.float32), refi.astype(jnp.float32),
                            atol=tol, rtol=tol), f"mismatch {shape} {dt}"

    print("KERNEL_OK")
</pallas_src>

<mosaic_0001>
module attributes {stable_mosaic.version = 11 : i64} {
  func.func @_log_softmax_cols_kernel(%arg0: i32, %arg1: memref<16x128xf32, #tpu.memory_space<vmem>>, %arg2: memref<16x128xf32, #tpu.memory_space<vmem>>) attributes {dimension_semantics = [#tpu.dimension_semantics<parallel>], iteration_bounds = array<i64: 1>, scalar_prefetch = 0 : i64, scratch_operands = 0 : i64, tpu.core_type = #tpu.core_type<tc>, window_params = [{transform_indices = @transform_0, window_bounds = array<i64: 16, 128>}, {transform_indices = @transform_1, window_bounds = array<i64: 16, 128>}]} {
    %c0 = arith.constant 0 : index
    %c0_0 = arith.constant 0 : index
    %0 = vector.load %arg1[%c0, %c0_0] : memref<16x128xf32, #tpu.memory_space<vmem>>, vector<16x128xf32>
    %cst = arith.constant dense<0xFF800000> : vector<128xf32>
    %1 = vector.multi_reduction <maximumf>, %0, %cst [0] : vector<16x128xf32> to vector<128xf32>
    %2 = vector.shape_cast %1 : vector<128xf32> to vector<1x128xf32>
    %3 = vector.broadcast %2 : vector<1x128xf32> to vector<16x128xf32>
    %4 = arith.subf %0, %3 : vector<16x128xf32>
    %5 = math.exp %4 : vector<16x128xf32>
    %cst_1 = arith.constant dense<0.000000e+00> : vector<128xf32>
    %6 = vector.multi_reduction <add>, %5, %cst_1 [0] : vector<16x128xf32> to vector<128xf32>
    %7 = vector.shape_cast %6 : vector<128xf32> to vector<1x128xf32>
    %8 = math.log %7 : vector<1x128xf32>
    %9 = vector.broadcast %8 : vector<1x128xf32> to vector<16x128xf32>
    %10 = arith.subf %4, %9 : vector<16x128xf32>
    %c0_2 = arith.constant 0 : index
    %c0_3 = arith.constant 0 : index
    %11 = vector.load %arg2[%c0_2, %c0_3] : memref<16x128xf32, #tpu.memory_space<vmem>>, vector<16x128xf32>
    tpu.vector_store %arg2[%c0_2, %c0_3], %10 {strides = array<i32>} : memref<16x128xf32, #tpu.memory_space<vmem>>, vector<16x128xf32>,
    return
  }
  func.func @transform_0(%arg0: i32) -> (i32, i32) {
    %c0_i32 = arith.constant 0 : i32
    %c0_i32_0 = arith.constant 0 : i32
    return %c0_i32, %arg0 : i32, i32
  }
  func.func @transform_1(%arg0: i32) -> (i32, i32) {
    %c0_i32 = arith.constant 0 : i32
    %c0_i32_0 = arith.constant 0 : i32
    return %c0_i32, %arg0 : i32, i32
  }
}

</mosaic_0001>

<bundles_post_ra>
// kernel: tpu_custom_call.1
= control target key start
LH: loop header
LB: loop body
LE: loop exit
PB: predicated region body
PF: predicated region fallthrough
CT: control target
= control target key end

     0   :  { %6 = vsyncpa [#allocation3], 0  ;;  %s148_s0 = inlined_call_operand.hbm [shape: f32[16,128], index: 0, kind: input, shape index: {}]   ;;  %s149_s1 = inlined_call_operand.hbm [shape: f32[16,128], index: 1, kind: output, shape index: {}]  }
   0x1   :  { %7 = vsyncpa [#allocation4], 0  ;;  %s122_s6 = smov [#allocation2]  }
   0x2   :  { %s13_s7 = sshll.u32 %s122_s6, 4  ;;  %s14_s7 = int_to_ptr.vmem [resolvable:$true] %s13_s7 }
   0x3   :  { %s86_s8 = scalar_lea.vmem %s14_s7, 256  ;;  %p91_p1 = scmp.lt.s32.totalorder %s14_s7, %s14_s7 }
   0x4   :  { %p87_p0 = scmp.ne.s32.totalorder %s14_s7, %s86_s8  ;;  %p92_p2 = scmp.lt.s32.totalorder %s86_s8, %s86_s8 }
   0x6   :  { %p93_p3 = por %p92_p2, %p91_p1 }
   0x8   :  { %p94_p4 = pnand %p93_p3, %p87_p0 }
   0xa   :  { %97 = shalt.err (!%p94_p4)
}
   0xb   :  { %s123_s9 = smov 128   ;;  %s124_s10 = smov 8  }
   0xc   :  { %19 = dma.hbm_to_vmem [thread:$0]  %s148_s0, 256, %s14_s7, [#allocation3], %s123_s9, %s123_s9, %s124_s10  }
   0xd   :  { %118 = dma.done.wait [#allocation3], 256  }
   0xe   :  { %119 = vsyncadd [#allocation3], 4294967040  ;;  %v23_v0 = vld [vmem:[#allocation2] sm:$0xff]  ;;  %v24_v1 = vld [vmem:[#allocation2 + $0x8] sm:$0xff]  ;;  %s125_s0 = smov [#allocation5]  }
   0xf   :  { %v25_v2 = vmax.f32 %v23_v0, %v24_v1  ;;  %s56_s13 = sshll.u32 %s125_s0, 4  ;;  %s57_s13 = int_to_ptr.vmem [resolvable:$true] %s56_s13 }
  0x10   :  { %s98_s14 = scalar_lea.vmem %s57_s13, 256  ;;  %p103_p6 = scmp.lt.s32.totalorder %s57_s13, %s57_s13 }
  0x11   :  { %v26_v3 = vrot.slane %v25_v2, 4  ;;  %p99_p5 = scmp.ne.s32.totalorder %s57_s13, %s98_s14  ;;  %p104_p7 = scmp.lt.s32.totalorder %s98_s14, %s98_s14 }
  0x13   :  { %v27_v4 = vmax.f32 %v25_v2, %v26_v3  ;;  %p105_p8 = por %p104_p7, %p103_p6 }
  0x15   :  { %v28_v5 = vrot.slane %v27_v4, 2  ;;  %p106_p9 = pnand %p105_p8, %p99_p5 }
  0x17   :  { %v29_v6 = vmax.f32 %v27_v4, %v28_v5 }
  0x19   :  { %v30_v7 = vrot.slane %v29_v6, 1 }
  0x1b   :  { %v31_v8 = vmax.f32 %v29_v6, %v30_v7 }
  0x1d   :  { %v32_v9 = vsub.f32 %v23_v0, %v31_v8  ;;  %v33_v10 = vsub.f32 %v24_v1, %v31_v8 }
  0x1f   :  { %v34_v11 = vmul.f32 1.442695, %v32_v9  ;;  %v36_v12 = vmul.f32 1.442695, %v33_v10 }
  0x21   :  { %72 = vpow2.f32 %v34_v11 }
  0x22   :  { %74 = vpow2.f32 %v36_v12 }
  0x2e   :  { %v73_v13 = vpop.eup %72 }
  0x2f   :  { %v75_v14 = vpop.eup %74 }
  0x30   :  { %v38_v15 = vadd.f32 %v75_v14, %v73_v13 }
  0x32   :  { %v39_v16 = vrot.slane %v38_v15, 4 }
  0x34   :  { %v40_v17 = vadd.f32 %v39_v16, %v38_v15 }
  0x36   :  { %v41_v18 = vrot.slane %v40_v17, 2 }
  0x38   :  { %v42_v19 = vadd.f32 %v41_v18, %v40_v17 }
  0x3a   :  { %v43_v20 = vrot.slane %v42_v19, 1 }
  0x3c   :  { %v44_v21 = vadd.f32 %v43_v20, %v42_v19 }
  0x3e   :  { %76 = vlog2.f32 %v44_v21 }
  0x4b   :  { %v77_v22 = vpop.eup %76 }
  0x4c   :  { %v46_v23 = vmul.f32 0.6931472, %v77_v22 }
  0x4e   :  { %v47_v24 = vsub.f32 %v32_v9, %v46_v23  ;;  %v48_v25 = vsub.f32 %v33_v10, %v46_v23 }
  0x50   :  { %49 = vst [vmem:[#allocation5] sm:$0xff] %v47_v24  ;;  %50 = vst [vmem:[#allocation5 + $0x8] sm:$0xff] %v48_v25 }
  0x51   :  { %109 = shalt.err (!%p106_p9)
}
  0x52   :  { %62 = dma.vmem_to_hbm [thread:$0]  %s57_s13, 256, %s149_s1, [#allocation4], %s123_s9, %s123_s9, %s124_s10  }
  0x53   :  { %120 = dma.done.wait [#allocation4], 256  }
  0x54   :  { %121 = vsyncadd [#allocation4], 4294967040 }
  0x55   :  { %66 = vsyncpa [#allocation3], 1 }
  0x56   :  { %67 = vsyncpa [#allocation4], 1 }

</bundles_post_ra>
